<compile_context>
chip_gen: v6e
topology: v6e:2x2x1
jax: 0.10.0
libtpu: 0.0.40
codegen_flags: <defaults>
</compile_context>

<pallas_src>
import functools

import jax
import jax.numpy as jnp
from jax.experimental import pallas as pl
from jax.experimental.pallas import tpu as pltpu


def _actor_kernel(x_ref, w1t_ref, b1_ref, w2t_ref, b2_ref, g_ref,
                  probs_ref, action_ref):
    x = x_ref[...]                                              # [TB, obs]

    # hidden1 + ReLU  (MXU matmul, f32 accumulation)
    h = jnp.dot(x, w1t_ref[...], preferred_element_type=jnp.float32)
    h = jnp.maximum(h + b1_ref[...], 0.0)                       # [TB, hidden]

    # hidden2 -> logits
    logits = jnp.dot(h, w2t_ref[...], preferred_element_type=jnp.float32)
    logits = logits + b2_ref[...]                               # [TB, act]

    # numerically stable softmax over the action axis (dim=1), exact divide
    m = jnp.max(logits, axis=-1, keepdims=True)
    e = jnp.exp(logits - m)
    denom = jnp.sum(e, axis=-1, keepdims=True)
    probs_ref[...] = e / denom

    # Fused Categorical(probs).sample() via Gumbel-max (noise supplied as an
    # input; argmax is shift-invariant so reuse logits - m).
    z = (logits - m) + g_ref[...]                               # [TB, act]
    z_max = jnp.max(z, axis=-1, keepdims=True)
    lane_idx = jax.lax.broadcasted_iota(jnp.int32, z.shape, 1)
    n_act = jnp.int32(z.shape[-1])
    cand = jnp.where(z >= z_max, lane_idx, n_act)
    idx = jnp.min(cand, axis=-1, keepdims=True)                 # [TB, 1]
    # NaN guard: if every comparison failed, clamp to a valid action index.
    action_ref[...] = jnp.minimum(idx, n_act - 1)


def _round_up(x, m):
    return ((x + m - 1) // m) * m


@functools.partial(jax.jit, static_argnames=("block_b",))
def actor_forward(state, w1t, b1, w2t, b2, key, *, block_b=512):
    """state: [B, obs] f32.  Pre-transposed params: w1t [obs, hidden],
    b1 [1, hidden], w2t [hidden, act], b2 [1, act].  key: jax PRNG key (caller
    must vary it per step).  Returns (action [B] int32, probs [B, act] f32)."""
    B, obs_dim = state.shape
    hidden = w1t.shape[1]
    act_dim = w2t.shape[1]

    # Batch tile: multiple of 8 sublanes, capped at block_b; pad B to fit.
    tb = min(block_b, _round_up(B, 8))
    b_pad = _round_up(B, tb)
    if b_pad != B:
        state = jnp.pad(state, ((0, b_pad - B), (0, 0)))
    grid = (b_pad // tb,)

    # Gumbel noise for the categorical sample (one draw per (row, action)).
    gumbel = jax.random.gumbel(key, (b_pad, act_dim), dtype=jnp.float32)

    probs, action = pl.pallas_call(
        _actor_kernel,
        out_shape=(
            jax.ShapeDtypeStruct((b_pad, act_dim), jnp.float32),  # probs
            jax.ShapeDtypeStruct((b_pad, 1), jnp.int32),          # action
        ),
        grid=grid,
        in_specs=[
            pl.BlockSpec((tb, obs_dim), lambda i: (i, 0)),         # state tile
            pl.BlockSpec((obs_dim, hidden), lambda i: (0, 0)),     # w1t resident
            pl.BlockSpec((1, hidden), lambda i: (0, 0)),           # b1 resident
            pl.BlockSpec((hidden, act_dim), lambda i: (0, 0)),     # w2t resident
            pl.BlockSpec((1, act_dim), lambda i: (0, 0)),          # b2 resident
            pl.BlockSpec((tb, act_dim), lambda i: (i, 0)),         # gumbel tile
        ],
        out_specs=(
            pl.BlockSpec((tb, act_dim), lambda i: (i, 0)),
            pl.BlockSpec((tb, 1), lambda i: (i, 0)),
        ),
        compiler_params=pltpu.CompilerParams(
            dimension_semantics=("parallel",)),
    )(state, w1t, b1, w2t, b2, gumbel)

    return action[:B, 0], probs[:B]


def init_params(key, obs_dim, hidden_size, act_dim):
    """PyTorch nn.Linear default init (uniform(-1/sqrt(fan_in), +)), stored
    pre-transposed / 2-D once so the per-call path has no layout glue."""
    k1, k2, k3, k4 = jax.random.split(key, 4)
    bound1 = 1.0 / jnp.sqrt(obs_dim)
    bound2 = 1.0 / jnp.sqrt(hidden_size)
    w1 = jax.random.uniform(k1, (hidden_size, obs_dim), jnp.float32,
                            -bound1, bound1)
    b1 = jax.random.uniform(k2, (hidden_size,), jnp.float32, -bound1, bound1)
    w2 = jax.random.uniform(k3, (act_dim, hidden_size), jnp.float32,
                            -bound2, bound2)
    b2 = jax.random.uniform(k4, (act_dim,), jnp.float32, -bound2, bound2)
    return (jnp.transpose(w1), b1.reshape(1, hidden_size),
            jnp.transpose(w2), b2.reshape(1, act_dim))


if __name__ == "__main__":
    # Small shapes consistent with the module's forward: state is [B, obs_dim].
    B, obs_dim, hidden_size, act_dim = 8, 16, 32, 8

    key = jax.random.PRNGKey(0)
    pkey, skey, gkey = jax.random.split(key, 3)

    w1t, b1, w2t, b2 = init_params(pkey, obs_dim, hidden_size, act_dim)
    state = jax.random.normal(skey, (B, obs_dim), dtype=jnp.float32)

    action, probs = actor_forward(state, w1t, b1, w2t, b2, gkey)
    action = jax.block_until_ready(action)
    probs = jax.block_until_ready(probs)

    # sanity: shapes, valid action indices, probs a valid distribution per row
    assert probs.shape == (B, act_dim)
    assert action.shape == (B,)
    assert action.dtype == jnp.int32
    assert bool(jnp.all((action >= 0) & (action < act_dim)))
    assert bool(jnp.all(jnp.abs(jnp.sum(probs, axis=1) - 1.0) < 1e-5))

    # reference check against plain JAX (module semantics)
    h_ref = jnp.maximum(state @ w1t + b1, 0.0)
    logits_ref = h_ref @ w2t + b2
    probs_ref = jax.nn.softmax(logits_ref, axis=1)
    assert bool(jnp.allclose(probs, probs_ref, atol=1e-5, rtol=1e-5))

    print("KERNEL_OK")
</pallas_src>

<mosaic_0001>
module attributes {stable_mosaic.version = 11 : i64} {
  func.func @_actor_kernel(%arg0: i32, %arg1: memref<8x16xf32, #tpu.memory_space<vmem>>, %arg2: memref<16x32xf32, #tpu.memory_space<vmem>>, %arg3: memref<1x32xf32, #tpu.memory_space<vmem>>, %arg4: memref<32x8xf32, #tpu.memory_space<vmem>>, %arg5: memref<1x8xf32, #tpu.memory_space<vmem>>, %arg6: memref<8x8xf32, #tpu.memory_space<vmem>>, %arg7: memref<8x8xf32, #tpu.memory_space<vmem>>, %arg8: memref<8x1xi32, #tpu.memory_space<vmem>>) attributes {dimension_semantics = [#tpu.dimension_semantics<parallel>], iteration_bounds = array<i64: 1>, scalar_prefetch = 0 : i64, scratch_operands = 0 : i64, tpu.core_type = #tpu.core_type<tc>, window_params = [{transform_indices = @transform_0, window_bounds = array<i64: 8, 16>}, {pipeline_mode = #tpu.pipeline_mode<synchronous>, transform_indices = @transform_1, window_bounds = array<i64: 16, 32>}, {pipeline_mode = #tpu.pipeline_mode<synchronous>, transform_indices = @transform_2, window_bounds = array<i64: 1, 32>}, {pipeline_mode = #tpu.pipeline_mode<synchronous>, transform_indices = @transform_3, window_bounds = array<i64: 32, 8>}, {pipeline_mode = #tpu.pipeline_mode<synchronous>, transform_indices = @transform_4, window_bounds = array<i64: 1, 8>}, {transform_indices = @transform_5, window_bounds = array<i64: 8, 8>}, {transform_indices = @transform_6, window_bounds = array<i64: 8, 8>}, {transform_indices = @transform_7, window_bounds = array<i64: 8, 1>}]} {
    %c0 = arith.constant 0 : index
    %c0_0 = arith.constant 0 : index
    %0 = vector.load %arg1[%c0, %c0_0] : memref<8x16xf32, #tpu.memory_space<vmem>>, vector<8x16xf32>
    %c0_1 = arith.constant 0 : index
    %c0_2 = arith.constant 0 : index
    %1 = vector.load %arg2[%c0_1, %c0_2] : memref<16x32xf32, #tpu.memory_space<vmem>>, vector<16x32xf32>
    %cst = arith.constant dense<0.000000e+00> : vector<8x32xf32>
    %2 = tpu.matmul %0, %1, %cst {dimension_numbers = #tpu.dot_dimension_numbers<[1], [0], [0], [1], [0, 0, 1, 1], [], []>} : vector<8x16xf32>, vector<16x32xf32>, vector<8x32xf32> -> vector<8x32xf32>
    %c0_3 = arith.constant 0 : index
    %c0_4 = arith.constant 0 : index
    %3 = vector.load %arg3[%c0_3, %c0_4] : memref<1x32xf32, #tpu.memory_space<vmem>>, vector<1x32xf32>
    %4 = vector.broadcast %3 : vector<1x32xf32> to vector<8x32xf32>
    %5 = arith.addf %2, %4 : vector<8x32xf32>
    %cst_5 = arith.constant 0.000000e+00 : f32
    %6 = vector.broadcast %cst_5 : f32 to vector<8x32xf32>
    %7 = arith.maximumf %5, %6 : vector<8x32xf32>
    %c0_6 = arith.constant 0 : index
    %c0_7 = arith.constant 0 : index
    %8 = vector.load %arg4[%c0_6, %c0_7] : memref<32x8xf32, #tpu.memory_space<vmem>>, vector<32x8xf32>
    %cst_8 = arith.constant dense<0.000000e+00> : vector<8x8xf32>
    %9 = tpu.matmul %7, %8, %cst_8 {dimension_numbers = #tpu.dot_dimension_numbers<[1], [0], [0], [1], [0, 0, 1, 1], [], []>} : vector<8x32xf32>, vector<32x8xf32>, vector<8x8xf32> -> vector<8x8xf32>
    %c0_9 = arith.constant 0 : index
    %c0_10 = arith.constant 0 : index
    %10 = vector.load %arg5[%c0_9, %c0_10] : memref<1x8xf32, #tpu.memory_space<vmem>>, vector<1x8xf32>
    %11 = vector.broadcast %10 : vector<1x8xf32> to vector<8x8xf32>
    %12 = arith.addf %9, %11 : vector<8x8xf32>
    %cst_11 = arith.constant dense<0xFF800000> : vector<8xf32>
    %13 = vector.multi_reduction <maximumf>, %12, %cst_11 [1] : vector<8x8xf32> to vector<8xf32>
    %14 = vector.shape_cast %13 : vector<8xf32> to vector<8x1xf32>
    %15 = vector.broadcast %14 : vector<8x1xf32> to vector<8x8xf32>
    %16 = arith.subf %12, %15 : vector<8x8xf32>
    %17 = math.exp %16 : vector<8x8xf32>
    %cst_12 = arith.constant dense<0.000000e+00> : vector<8xf32>
    %18 = vector.multi_reduction <add>, %17, %cst_12 [1] : vector<8x8xf32> to vector<8xf32>
    %19 = vector.shape_cast %18 : vector<8xf32> to vector<8x1xf32>
    %20 = vector.broadcast %19 : vector<8x1xf32> to vector<8x8xf32>
    %21 = arith.divf %17, %20 : vector<8x8xf32>
    %c0_13 = arith.constant 0 : index
    %c0_14 = arith.constant 0 : index
    %22 = vector.load %arg7[%c0_13, %c0_14] : memref<8x8xf32, #tpu.memory_space<vmem>>, vector<8x8xf32>
    tpu.vector_store %arg7[%c0_13, %c0_14], %21 {strides = array<i32>} : memref<8x8xf32, #tpu.memory_space<vmem>>, vector<8x8xf32>,
    %23 = vector.broadcast %14 : vector<8x1xf32> to vector<8x8xf32>
    %24 = arith.subf %12, %23 : vector<8x8xf32>
    %c0_15 = arith.constant 0 : index
    %c0_16 = arith.constant 0 : index
    %25 = vector.load %arg6[%c0_15, %c0_16] : memref<8x8xf32, #tpu.memory_space<vmem>>, vector<8x8xf32>
    %26 = arith.addf %24, %25 : vector<8x8xf32>
    %cst_17 = arith.constant dense<0xFF800000> : vector<8xf32>
    %27 = vector.multi_reduction <maximumf>, %26, %cst_17 [1] : vector<8x8xf32> to vector<8xf32>
    %28 = vector.shape_cast %27 : vector<8xf32> to vector<8x1xf32>
    %29 = tpu.iota {dimensions = array<i32: 1>} : vector<8x8xi32>
    %30 = vector.broadcast %28 : vector<8x1xf32> to vector<8x8xf32>
    %31 = arith.cmpf oge, %26, %30 : vector<8x8xf32>
    %c8_i32 = arith.constant 8 : i32
    %32 = vector.broadcast %c8_i32 : i32 to vector<8x8xi32>
    %33 = arith.select %31, %29, %32 : vector<8x8xi1>, vector<8x8xi32>
    %cst_18 = arith.constant dense<2147483647> : vector<8xi32>
    %34 = vector.multi_reduction <minsi>, %33, %cst_18 [1] : vector<8x8xi32> to vector<8xi32>
    %35 = vector.shape_cast %34 : vector<8xi32> to vector<8x1xi32>
    %c8_i32_19 = arith.constant 8 : i32
    %c1_i32 = arith.constant 1 : i32
    %36 = arith.subi %c8_i32_19, %c1_i32 : i32
    %37 = vector.broadcast %36 : i32 to vector<8x1xi32>
    %38 = arith.minsi %35, %37 : vector<8x1xi32>
    %c0_20 = arith.constant 0 : index
    %c0_21 = arith.constant 0 : index
    %39 = vector.load %arg8[%c0_20, %c0_21] : memref<8x1xi32, #tpu.memory_space<vmem>>, vector<8x1xi32>
    tpu.vector_store %arg8[%c0_20, %c0_21], %38 {strides = array<i32>} : memref<8x1xi32, #tpu.memory_space<vmem>>, vector<8x1xi32>,
    return
  }
  func.func @transform_0(%arg0: i32) -> (i32, i32) {
    %c0_i32 = arith.constant 0 : i32
    %c0_i32_0 = arith.constant 0 : i32
    return %arg0, %c0_i32 : i32, i32
  }
  func.func @transform_1(%arg0: i32) -> (i32, i32) {
    %c0_i32 = arith.constant 0 : i32
    %c0_i32_0 = arith.constant 0 : i32
    %c0_i32_1 = arith.constant 0 : i32
    return %c0_i32, %c0_i32_0 : i32, i32
  }
  func.func @transform_2(%arg0: i32) -> (i32, i32) {
    %c0_i32 = arith.constant 0 : i32
    %c0_i32_0 = arith.constant 0 : i32
    %c0_i32_1 = arith.constant 0 : i32
    return %c0_i32, %c0_i32_0 : i32, i32
  }
  func.func @transform_3(%arg0: i32) -> (i32, i32) {
    %c0_i32 = arith.constant 0 : i32
    %c0_i32_0 = arith.constant 0 : i32
    %c0_i32_1 = arith.constant 0 : i32
    return %c0_i32, %c0_i32_0 : i32, i32
  }
  func.func @transform_4(%arg0: i32) -> (i32, i32) {
    %c0_i32 = arith.constant 0 : i32
    %c0_i32_0 = arith.constant 0 : i32
    %c0_i32_1 = arith.constant 0 : i32
    return %c0_i32, %c0_i32_0 : i32, i32
  }
  func.func @transform_5(%arg0: i32) -> (i32, i32) {
    %c0_i32 = arith.constant 0 : i32
    %c0_i32_0 = arith.constant 0 : i32
    return %arg0, %c0_i32 : i32, i32
  }
  func.func @transform_6(%arg0: i32) -> (i32, i32) {
    %c0_i32 = arith.constant 0 : i32
    %c0_i32_0 = arith.constant 0 : i32
    return %arg0, %c0_i32 : i32, i32
  }
  func.func @transform_7(%arg0: i32) -> (i32, i32) {
    %c0_i32 = arith.constant 0 : i32
    %c0_i32_0 = arith.constant 0 : i32
    return %arg0, %c0_i32 : i32, i32
  }
}

</mosaic_0001>

<bundles_post_ra>
// kernel: actor_forward.1
= control target key start
LH: loop header
LB: loop body
LE: loop exit
PB: predicated region body
PF: predicated region fallthrough
CT: control target
= control target key end

     0   :  { %v314_v1 = vmov 0.0   ;;  %vm315_vm0 = vmmov 0   ;;  %s398_s0 = inlined_call_operand.vmem [shape: f32[8,16], index: 0, kind: input, shape index: {}]   ;;  %s399_s1 = inlined_call_operand.vmem [shape: f32[16,32], index: 1, kind: input, shape index: {}]   ;;  %s400_s2 = inlined_call_operand.vmem [shape: f32[1,32], index: 2, kind: input, shape index: {}]   ;;  %s401_s3 = inlined_call_operand.vmem [shape: f32[32,8], index: 3, kind: input, shape index: {}]   ;;  %s402_s4 = inlined_call_operand.vmem [shape: f32[1,8], index: 4, kind: input, shape index: {}]   ;;  %s403_s5 = inlined_call_operand.vmem [shape: f32[8,8], index: 5, kind: input, shape index: {}]   ;;  %s404_s6 = inlined_call_operand.hbm [shape: f32[8,8], index: 6, kind: output, shape index: {0}]   ;;  %s405_s7 = inlined_call_operand.vmem [shape: s32[8,1], index: 7, kind: output, shape index: {1}]  }
   0x1   :  { %v28_v0 = vld [vmem:[%s399_s1 + $0x8] sm:$0xff]  ;;  %267 = vmatprep.subr.mxu0 %v314_v1  ;;  %v27_v2 = vld [vmem:[%s399_s1] sm:$0xff]  ;;  %271 = vmatprep.mubr.msk.f32.mxu0 %vm315_vm0, %v314_v1  ;;  %v114_v3 = vld [vmem:[%s401_s3 + $0x18] sm:$0xff] }
   0x2   :  { %13 = vsyncpa [#allocation3], 0  ;;  %268 = vmatpush3.msra.mxu0 %v28_v0  ;;  %v26_v4 = vld [vmem:[%s398_s0] sm:$0xff]  ;;  %vm36_vm1 = vcmask 130048   ;;  %274 = vmatprep.subr.mxu1 %v314_v1  ;;  %v113_v5 = vld [vmem:[%s401_s3 + $0x10] sm:$0xff]  ;;  %vm122_vm2 = vcmask 261120   ;;  %v214_v24 = vlaneseq }
   0x3   :  { %269 = vmatprep.subr.mxu0 %v314_v1  ;;  %275 = vmatpush3.msra.mxu1 %v114_v3  ;;  %v112_v6 = vld [vmem:[%s401_s3 + $0x8] sm:$0xff]  ;;  %v111_v7 = vld [vmem:[%s401_s3] sm:$0xff]  ;;  %vm196_vm3 = vcmask 64512  }
   0x4   :  { %270 = vmatpush3.msra.mxu0 %v27_v2  ;;  %276 = vmatprep.subr.mxu1 %v314_v1  ;;  %v255_v8 = vld [vmem:[%s400_s2] ss:$0 sm:$0xff]  ;;  %v215_v25 = vand.u32 127, %v214_v24 }
   0x5   :  { %272 = vmatmul.mubr.msk.f32.vlgmr.msra.gmra.mxu0 %vm36_vm1, %v26_v4  ;;  %282 = vmatprep.mubr.msk.f32.mxu1 %vm315_vm0, %v314_v1  ;;  %v257_v13 = vld [vmem:[%s402_s4] ss:$0 sm:$0xff]  ;;  %s316_s4 = smov [#allocation2]  }
   0x6   :  { %277 = vmatpush3.msra.mxu1 %v113_v5  ;;  %v209_v19 = vld [vmem:[%s403_s5] sm:$0xff]  ;;  %s243_s5 = sshll.u32 %s316_s4, 4  ;;  %s244_s5 = int_to_ptr.vmem [resolvable:$true] %s243_s5 }
   0x7   :  { %278 = vmatprep.subr.mxu1 %v314_v1  ;;  %s292_s17 = scalar_lea.vmem %s244_s5, 128  ;;  %p297_p1 = scmp.lt.s32.totalorder %s244_s5, %s244_s5 }
   0x8   :  { %279 = vmatpush3.msra.mxu1 %v112_v6  ;;  %p293_p0 = scmp.ne.s32.totalorder %s244_s5, %s292_s17  ;;  %p298_p2 = scmp.lt.s32.totalorder %s292_s17, %s292_s17 }
   0x9   :  { %280 = vmatprep.subr.mxu1 %v314_v1 }
   0xa   :  { %281 = vmatpush3.msra.mxu1 %v111_v7  ;;  %p299_p3 = por %p298_p2, %p297_p1 }
   0xc   :  { %p300_p4 = pnand %p299_p3, %p293_p0 }
  0xc5   :  { %v106_v9 = vpop.f32.mrf.mxu0 }
  0xc6   :  { %v107_v10 = vadd.f32 %v255_v8, %v106_v9 }
  0xc7   :  { %v273_v11 = vpop.f32.mrf.mxu0 }
  0xc8   :  { %v110_v12 = vmax.f32 %v107_v10, 0.0 }
  0xca   :  { %283 = vmatmul.mubr.msk.f32.vlgmr.msra.gmra.mxu1 %vm122_vm2, %v110_v12 }
 0x18a   :  { %v192_v14 = vpop.f32.mrf.mxu1 }
 0x18b   :  { %v193_v15 = vadd.f32 %v257_v13, %v192_v14 }
 0x18c   :  { %v284_v16 = vpop.f32.mrf.mxu1 }
 0x18d   :  { %v197_v17 = vsel %vm196_vm3, %v193_v15, -inf }
 0x18e   :  { %198 = vmax.xlane.f32.xlu0 %v197_v17 }
 0x217   :  { %v199_v18 = vpop.xlane.xlu0 %198 }
 0x218   :  { %v200_v20 = vsub.f32 %v193_v15, %v199_v18 }
 0x21a   :  { %v210_v21 = vadd.f32 %v209_v19, %v200_v20  ;;  %v201_v23 = vmul.f32 1.442695, %v200_v20 }
 0x21c   :  { %v211_v22 = vsel %vm196_vm3, %v210_v21, -inf  ;;  %288 = vpow2.f32 %v201_v23 }
 0x21d   :  { %212 = vmax.xlane.f32.xlu0 %v211_v22 }
 0x229   :  { %v289_v31 = vpop.eup %288 }
 0x22a   :  { %v203_v32 = vsel %vm196_vm3, %v289_v31, 0.0 }
 0x2a6   :  { %v213_v26 = vpop.xlane.xlu0 %212 }
 0x2a7   :  { %vm216_vm4 = vcmp.ge.f32.partialorder %v210_v21, %v213_v26 }
 0x2a8   :  { %v217_v27 = vsel %vm216_vm4, %v215_v25, 8 }
 0x2a9   :  { %v218_v28 = vsel %vm196_vm3, %v217_v27, 2147483647 }
 0x2aa   :  { %v220_v29 = vshra.s32 %v218_v28, 16  ;;  %v219_v33 = vand.u32 65535, %v218_v28 }
 0x2ac   :  { %v222_v30 = vcvt.s32.f32 %v220_v29  ;;  %v221_v35 = vcvt.s32.f32 %v219_v33 }
 0x2ae   :  { %223 = vmin.xlane.f32.xlu1 %v222_v30 }
 0x2b2   :  { %204 = vadd.xlane.f32.xlu1 %v203_v32 }
 0x337   :  { %v224_v34 = vpop.xlane.xlu1 %223 }
 0x338   :  { %vm225_vm5 = vcmp.eq.f32.partialorder %v222_v30, %v224_v34 }
 0x339   :  { %v226_v36 = vsel %vm225_vm5, %v221_v35, inf }
 0x33a   :  { %227 = vmin.xlane.f32.xlu0 %v226_v36 }
 0x33b   :  { %v205_v37 = vpop.xlane.xlu1 %204 }
 0x33c   :  { %290 = vrcp.f32 %v205_v37 }
 0x349   :  { %v291_v38 = vpop.eup %290 }
 0x34a   :  { %v207_v39 = vmul.f32 %v291_v38, %v289_v31 }
 0x34c   :  { %208 = vst.msk [vmem:[#allocation2] sm:$0xff] %vm196_vm3, %v207_v39 }
 0x34d   :  { %303 = shalt.err (!%p300_p4)
}
 0x34e   :  { %246 = dma.vmem_to_hbm [thread:$0]  %s244_s5, 128, %s404_s6, [#allocation3]   ;;  %v230_v40 = vcvt.f32.s32 %v224_v34  ;;  %vm235_vm6 = vcmask 7168  }
 0x350   :  { %v231_v42 = vshll.u32 %v230_v40, 16 }
 0x3c3   :  { %v228_v41 = vpop.xlane.xlu0 %227 }
 0x3c4   :  { %v229_v43 = vcvt.f32.s32 %v228_v41 }
 0x3c6   :  { %v232_v44 = vadd.s32 %v231_v42, %v229_v43 }
 0x3c8   :  { %vm233_vm7 = vcmp.lt.s32.totalorder %v232_v44, 7 }
 0x3c9   :  { %v234_v45 = vsel %vm233_vm7, %v232_v44, 7 }
 0x3ca   :  { %236 = vst.msk [vmem:[%s405_s7] sm:$0xff] %vm235_vm6, %v234_v45 }
 0x3cb   :  { %312 = dma.done.wait [#allocation3], 128  }
 0x3cc   :  { %313 = vsyncadd [#allocation3], 4294967168 }
 0x3cd   :  { %254 = vsyncpa [#allocation3], 1 }

</bundles_post_ra>
